<compile_context>
chip_gen: v5e
topology: v5e:2x2
jax: 0.10.0
libtpu: 0.0.40
codegen_flags: <defaults>
</compile_context>

<pallas_src>
import math

import numpy as np
import jax
import jax.numpy as jnp
from jax import lax
from jax.experimental import pallas as pl
from jax.experimental.pallas import tpu as pltpu


def _round_up(n, m):
    return ((n + m - 1) // m) * m


# ----------------------------------------------------------------------------
# Deterministic parameter initialization (mirrors ESN._init_parameters).
# ----------------------------------------------------------------------------
def _binom_ppf(q, n, p=0.5):
    # smallest k with CDF(k) >= q (scipy.stats.binom.ppf equivalent)
    cdf = 0.0
    for k in range(n + 1):
        cdf += math.comb(n, k) * (p ** k) * ((1.0 - p) ** (n - k))
        if cdf >= q - 1e-12:
            return float(k)
    return float(n)


def init_esn_params(input_size, hidden_size, q=0.95, sparsity=0.1, seed=0):
    rng = np.random.RandomState(seed)

    # weight_ih_l0: randint(2) * (6/quantile) - 3/quantile
    input_quantile = _binom_ppf(q, input_size, 0.5)
    w_ih = (rng.randint(0, 2, size=(hidden_size, input_size)).astype(np.float32)
            * (6.0 / input_quantile) - 3.0 / input_quantile)

    # weight_hh_l0: randn, sparsified with Dropout(p=1-sparsity), rescaled so
    # that the spectral radius is 0.99.
    w_hh = rng.randn(hidden_size, hidden_size).astype(np.float32)
    keep = (rng.rand(hidden_size, hidden_size) < sparsity).astype(np.float32)
    w_hh = w_hh * keep / sparsity  # dropout scales kept entries by 1/keep_prob
    eig = np.linalg.eigvals(w_hh)
    spectral_radius = np.abs(eig).max()
    w_hh = w_hh / (spectral_radius / 0.99)

    return jnp.asarray(w_ih, jnp.float32), jnp.asarray(w_hh, jnp.float32)


# ----------------------------------------------------------------------------
# Per-generation VMEM budget.
# ----------------------------------------------------------------------------
def _vmem_limit_bytes():
    """~80% of physical VMEM: ~102 MiB on 128-MiB v5e/v6e, ~51 MiB on 64-MiB
    (per-TC) v7x.  Conservative 64-MiB fallback if the query is unavailable."""
    cap = 64 * 1024 * 1024
    try:
        cap = int(getattr(pltpu.get_tpu_info(), "vmem_capacity_bytes", cap))
    except Exception:
        pass
    return int(cap * 4 // 5)


# ----------------------------------------------------------------------------
# Fused Pallas kernel: per time block, compute the input projection and run the
# leaky-tanh recurrence with h carried in a VMEM scratch accumulator.
# ----------------------------------------------------------------------------
def make_fused_esn_kernel(leak, tb, mm_dtype):
    leak = float(leak)  # baked into the trace; changing leak retraces

    def kernel(x_ref, wih_t_ref, whh_t_ref, o_ref, h_scr):
        # Time is the innermost grid axis: init h once per batch block.
        @pl.when(pl.program_id(1) == 0)
        def _():
            h_scr[...] = jnp.zeros_like(h_scr)          # h_0 = zeros

        def step(s, h):
            # Input projection is independent of h, so under the unrolled loop
            # it hides beneath the serial h @ W_hh^T chain.  Weight refs are
            # read inside the dots (never hoisted/materialized across the
            # unroll) so vreg pressure stays bounded to h + one operand stripe.
            u = jnp.dot(x_ref[s], wih_t_ref[...],
                        preferred_element_type=jnp.float32)
            # TODO(synk): for large H_pad, drive this with
            # pltpu.matmul_push_rhs / matmul_acc_lhs / matmul_pop so the W_hh^T
            # tiles stay resident in MXU staging across all tb unrolled steps
            # (the hold-RHS-across-many-LHS case).
            hh = jnp.dot(h.astype(mm_dtype), whh_t_ref[...],
                         preferred_element_type=jnp.float32)
            h = (1.0 - leak) * h + leak * jnp.tanh(u + hh)
            o_ref[s] = h.astype(o_ref.dtype)
            return h

        # Unrolled inner loop over the time block: amortizes grid-step overhead
        # and gives the LLO scheduler a long straight-line region.
        h_scr[...] = lax.fori_loop(0, tb, step, h_scr[...], unroll=True)

    return kernel


# ----------------------------------------------------------------------------
# Padded forward: (T, B, I) -> (T, B, H)
# ----------------------------------------------------------------------------
def esn_forward_padded(x_tbi, w_ih, w_hh, leak, *, time_block=16,
                       matmul_dtype=jnp.float32):
    """matmul_dtype=jnp.bfloat16 feeds bf16 operands to the MXU (v6e/v7x);
    accumulation, tanh and the leak update always stay float32."""
    T, B, I = x_tbi.shape
    H = w_ih.shape[0]
    mm_dtype = matmul_dtype
    is_bf16 = (mm_dtype == jnp.bfloat16)
    min_sub = 16 if is_bf16 else 8            # bf16 packs 16 sublanes/vreg

    # Batch padding + batch blocking: two "parallel" batch blocks lets v7x's
    # two TensorCores each run half of the (time-serial) recurrence.
    B_pad = _round_up(B, min_sub)
    if B_pad >= 2 * min_sub:
        B_pad = _round_up(B_pad, 2 * min_sub)
        n_b_blocks = 2
    else:
        n_b_blocks = 1
    B_blk = B_pad // n_b_blocks

    H_pad = _round_up(H, 128)                 # lane multiple -> lane-dense stores
    tb = max(1, min(int(time_block), T))
    T_pad = _round_up(T, tb)
    n_t_blocks = T_pad // tb

    # Pre-transpose (+ zero-pad) weights in the wrapper: no .T in-kernel, and
    # zero padding keeps padded lanes / rows exactly zero through the recurrence.
    wih_t = jnp.zeros((I, H_pad), mm_dtype).at[:, :H].set(
        w_ih.T.astype(mm_dtype))
    whh_t = jnp.zeros((H_pad, H_pad), mm_dtype).at[:H, :H].set(
        w_hh.T.astype(mm_dtype))
    x_pad = jnp.zeros((T_pad, B_pad, I), mm_dtype).at[:T, :B, :].set(
        x_tbi.astype(mm_dtype))

    kernel = make_fused_esn_kernel(leak, tb, mm_dtype)

    h_pad = pl.pallas_call(
        kernel,
        out_shape=jax.ShapeDtypeStruct((T_pad, B_pad, H_pad), jnp.float32),
        grid_spec=pltpu.PrefetchScalarGridSpec(
            num_scalar_prefetch=0,
            grid=(n_b_blocks, n_t_blocks),    # batch blocks outer, time inner
            in_specs=[
                pl.BlockSpec((tb, B_blk, I), lambda b, t: (t, b, 0)),
                # Constant index maps: the pipeline does not re-DMA the weights
                # across grid steps.  (pipeline_mode=pl.Buffered(1) would also
                # halve the resident weight footprint for very large H_pad.)
                pl.BlockSpec((I, H_pad), lambda b, t: (0, 0)),
                pl.BlockSpec((H_pad, H_pad), lambda b, t: (0, 0)),
            ],
            out_specs=pl.BlockSpec((tb, B_blk, H_pad), lambda b, t: (t, b, 0)),
            scratch_shapes=[pltpu.VMEM((B_blk, H_pad), jnp.float32)],
        ),
        compiler_params=pltpu.CompilerParams(
            dimension_semantics=("parallel", "arbitrary"),
            vmem_limit_bytes=_vmem_limit_bytes(),
        ),
    )(x_pad, wih_t, whh_t)

    return h_pad[:T, :B, :H]


# ----------------------------------------------------------------------------
# Audition wrapper: padded (T, B, I) + lengths -> packed output data.
# ----------------------------------------------------------------------------
def audition_forward(x_tbi, lengths, w_ih, w_hh, leak, *, time_block=16,
                     matmul_dtype=jnp.float32):
    """Returns (packed_data [sum(lengths), H], batch_sizes [T])."""
    T, B, _ = x_tbi.shape
    lengths = np.asarray(lengths)
    assert np.all(lengths[:-1] >= lengths[1:]), "lengths must be sorted decreasing"
    assert np.all(lengths >= 1) and np.all(lengths <= T), "invalid lengths"
    batch_sizes = (lengths[None, :] > np.arange(T)[:, None]).sum(axis=1).astype(np.int64)

    padded_h = esn_forward_padded(x_tbi, w_ih, w_hh, leak,
                                  time_block=time_block,
                                  matmul_dtype=matmul_dtype)     # (T, B, H)
    H = padded_h.shape[-1]

    # Pack with a single static gather.  PackedSequence order is row-major over
    # (t, b) of the valid mask because lengths are sorted decreasing.
    valid = np.arange(T)[:, None] < lengths[None, :]             # (T, B)
    flat_idx = jnp.asarray(np.flatnonzero(valid.reshape(-1)), jnp.int32)
    packed = jnp.take(padded_h.reshape(T * B, H), flat_idx, axis=0)
    return packed, batch_sizes


# ----------------------------------------------------------------------------
# Pure-JAX reference (mirrors ESN._forward_per_layer on the padded view).
# ----------------------------------------------------------------------------
def esn_reference(x_tbi, w_ih, w_hh, leak):
    T, B, _ = x_tbi.shape
    H = w_ih.shape[0]
    h = jnp.zeros((B, H), jnp.float32)
    outs = []
    for t in range(T):
        pre = x_tbi[t] @ w_ih.T + h @ w_hh.T
        h = (1.0 - leak) * h + leak * jnp.tanh(pre)
        outs.append(h)
    return jnp.stack(outs, axis=0)


if __name__ == "__main__":
    # Small shapes consistent with the module.
    input_size, hidden_size = 16, 32
    esn_leak = 0.5
    T, B = 8, 4
    lengths = [8, 7, 5, 3]          # sorted decreasing (packed-seq convention)

    w_ih, w_hh = init_esn_params(input_size, hidden_size, seed=0)

    key = jax.random.PRNGKey(0)
    x = jax.random.normal(key, (T, B, input_size), dtype=jnp.float32)
    # Zero out padded positions (beyond each sequence's length) for cleanliness.
    t_idx = jnp.arange(T)[:, None]
    len_arr = jnp.asarray(lengths)[None, :]
    mask = (t_idx < len_arr).astype(jnp.float32)[:, :, None]
    x = x * mask

    # f32 path, time_block=4 -> two sequential time blocks (exercises the
    # VMEM-carried hidden state across grid steps).
    packed_out, batch_sizes = audition_forward(
        x, lengths, w_ih, w_hh, esn_leak, time_block=4)
    packed_out = jax.block_until_ready(packed_out)

    # Correctness check against the pure-JAX reference.
    ref_padded = esn_reference(x, w_ih, w_hh, esn_leak)
    valid = np.arange(T)[:, None] < np.asarray(lengths)[None, :]
    ref_packed = np.asarray(ref_padded).reshape(T * B, hidden_size)[valid.reshape(-1)]
    np.testing.assert_allclose(np.asarray(packed_out), ref_packed,
                               rtol=1e-4, atol=1e-4)
    assert packed_out.shape == (int(sum(lengths)), hidden_size)
    assert int(batch_sizes.sum()) == int(sum(lengths))

    # bf16 MXU-operand path (f32 accumulation / tanh / leak update): operand
    # rounding compounds over T steps, so use a looser tolerance.
    packed_bf16, _ = audition_forward(
        x, lengths, w_ih, w_hh, esn_leak, time_block=16,
        matmul_dtype=jnp.bfloat16)
    packed_bf16 = jax.block_until_ready(packed_bf16)
    np.testing.assert_allclose(np.asarray(packed_bf16), ref_packed,
                               rtol=5e-2, atol=5e-2)

    print("KERNEL_OK")
</pallas_src>

<mosaic_0001>
module attributes {stable_mosaic.version = 11 : i64} {
  func.func @kernel(%arg0: i32, %arg1: i32, %arg2: memref<4x8x16xf32, #tpu.memory_space<vmem>>, %arg3: memref<16x128xf32, #tpu.memory_space<vmem>>, %arg4: memref<128x128xf32, #tpu.memory_space<vmem>>, %arg5: memref<4x8x128xf32, #tpu.memory_space<vmem>>, %arg6: memref<8x128xf32, #tpu.memory_space<vmem>>) attributes {dimension_semantics = [#tpu.dimension_semantics<parallel>, #tpu.dimension_semantics<arbitrary>], iteration_bounds = array<i64: 1, 2>, scalar_prefetch = 0 : i64, scratch_operands = 1 : i64, tpu.core_type = #tpu.core_type<tc>, window_params = [{transform_indices = @transform_0, window_bounds = array<i64: 4, 8, 16>}, {pipeline_mode = #tpu.pipeline_mode<synchronous>, transform_indices = @transform_1, window_bounds = array<i64: 16, 128>}, {pipeline_mode = #tpu.pipeline_mode<synchronous>, transform_indices = @transform_2, window_bounds = array<i64: 128, 128>}, {transform_indices = @transform_3, window_bounds = array<i64: 4, 8, 128>}]} {
    %c0_i32 = arith.constant 0 : i32
    %0 = arith.cmpi eq, %arg1, %c0_i32 : i32
    %1 = arith.extui %0 : i1 to i32
    %c0_i32_0 = arith.constant 0 : i32
    %2 = arith.cmpi ne, %1, %c0_i32_0 : i32
    scf.if %2 {
      %cst_52 = arith.constant 0.000000e+00 : f32
      %77 = vector.broadcast %cst_52 : f32 to vector<8x128xf32>
      %c0_53 = arith.constant 0 : index
      %c0_54 = arith.constant 0 : index
      %78 = vector.load %arg6[%c0_53, %c0_54] : memref<8x128xf32, #tpu.memory_space<vmem>>, vector<8x128xf32>
      tpu.vector_store %arg6[%c0_53, %c0_54], %77 {strides = array<i32>} : memref<8x128xf32, #tpu.memory_space<vmem>>, vector<8x128xf32>,
    } else {
    }
    %c0 = arith.constant 0 : index
    %c0_1 = arith.constant 0 : index
    %3 = vector.load %arg6[%c0, %c0_1] : memref<8x128xf32, #tpu.memory_space<vmem>>, vector<8x128xf32>
    %c0_i32_2 = arith.constant 0 : i32
    %4 = arith.index_cast %c0_i32_2 : i32 to index
    %c0_3 = arith.constant 0 : index
    %c0_4 = arith.constant 0 : index
    %5 = vector.load %arg2[%4, %c0_3, %c0_4] : memref<4x8x16xf32, #tpu.memory_space<vmem>>, vector<1x8x16xf32>
    %6 = vector.shape_cast %5 : vector<1x8x16xf32> to vector<8x16xf32>
    %c0_5 = arith.constant 0 : index
    %c0_6 = arith.constant 0 : index
    %7 = vector.load %arg3[%c0_5, %c0_6] : memref<16x128xf32, #tpu.memory_space<vmem>>, vector<16x128xf32>
    %cst = arith.constant dense<0.000000e+00> : vector<8x128xf32>
    %8 = tpu.matmul %6, %7, %cst {dimension_numbers = #tpu.dot_dimension_numbers<[1], [0], [0], [1], [0, 0, 1, 1], [], []>} : vector<8x16xf32>, vector<16x128xf32>, vector<8x128xf32> -> vector<8x128xf32>
    %c0_7 = arith.constant 0 : index
    %c0_8 = arith.constant 0 : index
    %9 = vector.load %arg4[%c0_7, %c0_8] : memref<128x128xf32, #tpu.memory_space<vmem>>, vector<128x128xf32>
    %cst_9 = arith.constant dense<0.000000e+00> : vector<8x128xf32>
    %10 = tpu.matmul %3, %9, %cst_9 {dimension_numbers = #tpu.dot_dimension_numbers<[1], [0], [0], [1], [0, 0, 1, 1], [], []>} : vector<8x128xf32>, vector<128x128xf32>, vector<8x128xf32> -> vector<8x128xf32>
    %cst_10 = arith.constant 5.000000e-01 : f32
    %11 = vector.broadcast %cst_10 : f32 to vector<8x128xf32>
    %12 = arith.mulf %11, %3 : vector<8x128xf32>
    %13 = arith.addf %8, %10 : vector<8x128xf32>
    %14 = math.tanh %13 : vector<8x128xf32>
    %cst_11 = arith.constant 5.000000e-01 : f32
    %15 = vector.broadcast %cst_11 : f32 to vector<8x128xf32>
    %16 = arith.mulf %15, %14 : vector<8x128xf32>
    %17 = arith.addf %12, %16 : vector<8x128xf32>
    %18 = arith.index_cast %c0_i32_2 : i32 to index
    %c0_12 = arith.constant 0 : index
    %c0_13 = arith.constant 0 : index
    %19 = vector.load %arg5[%18, %c0_12, %c0_13] : memref<4x8x128xf32, #tpu.memory_space<vmem>>, vector<1x8x128xf32>
    %20 = vector.shape_cast %19 : vector<1x8x128xf32> to vector<8x128xf32>
    %21 = vector.shape_cast %17 : vector<8x128xf32> to vector<1x8x128xf32>
    tpu.vector_store %arg5[%18, %c0_12, %c0_13], %21 {strides = array<i32>} : memref<4x8x128xf32, #tpu.memory_space<vmem>>, vector<1x8x128xf32>,
    %c1_i32 = arith.constant 1 : i32
    %22 = arith.index_cast %c1_i32 : i32 to index
    %c0_14 = arith.constant 0 : index
    %c0_15 = arith.constant 0 : index
    %23 = vector.load %arg2[%22, %c0_14, %c0_15] : memref<4x8x16xf32, #tpu.memory_space<vmem>>, vector<1x8x16xf32>
    %24 = vector.shape_cast %23 : vector<1x8x16xf32> to vector<8x16xf32>
    %c0_16 = arith.constant 0 : index
    %c0_17 = arith.constant 0 : index
    %25 = vector.load %arg3[%c0_16, %c0_17] : memref<16x128xf32, #tpu.memory_space<vmem>>, vector<16x128xf32>
    %cst_18 = arith.constant dense<0.000000e+00> : vector<8x128xf32>
    %26 = tpu.matmul %24, %25, %cst_18 {dimension_numbers = #tpu.dot_dimension_numbers<[1], [0], [0], [1], [0, 0, 1, 1], [], []>} : vector<8x16xf32>, vector<16x128xf32>, vector<8x128xf32> -> vector<8x128xf32>
    %c0_19 = arith.constant 0 : index
    %c0_20 = arith.constant 0 : index
    %27 = vector.load %arg4[%c0_19, %c0_20] : memref<128x128xf32, #tpu.memory_space<vmem>>, vector<128x128xf32>
    %cst_21 = arith.constant dense<0.000000e+00> : vector<8x128xf32>
    %28 = tpu.matmul %17, %27, %cst_21 {dimension_numbers = #tpu.dot_dimension_numbers<[1], [0], [0], [1], [0, 0, 1, 1], [], []>} : vector<8x128xf32>, vector<128x128xf32>, vector<8x128xf32> -> vector<8x128xf32>
    %cst_22 = arith.constant 5.000000e-01 : f32
    %29 = vector.broadcast %cst_22 : f32 to vector<8x128xf32>
    %30 = arith.mulf %29, %17 : vector<8x128xf32>
    %31 = arith.addf %26, %28 : vector<8x128xf32>
    %32 = math.tanh %31 : vector<8x128xf32>
    %cst_23 = arith.constant 5.000000e-01 : f32
    %33 = vector.broadcast %cst_23 : f32 to vector<8x128xf32>
    %34 = arith.mulf %33, %32 : vector<8x128xf32>
    %35 = arith.addf %30, %34 : vector<8x128xf32>
    %36 = arith.index_cast %c1_i32 : i32 to index
    %c0_24 = arith.constant 0 : index
    %c0_25 = arith.constant 0 : index
    %37 = vector.load %arg5[%36, %c0_24, %c0_25] : memref<4x8x128xf32, #tpu.memory_space<vmem>>, vector<1x8x128xf32>
    %38 = vector.shape_cast %37 : vector<1x8x128xf32> to vector<8x128xf32>
    %39 = vector.shape_cast %35 : vector<8x128xf32> to vector<1x8x128xf32>
    tpu.vector_store %arg5[%36, %c0_24, %c0_25], %39 {strides = array<i32>} : memref<4x8x128xf32, #tpu.memory_space<vmem>>, vector<1x8x128xf32>,
    %c2_i32 = arith.constant 2 : i32
    %40 = arith.index_cast %c2_i32 : i32 to index
    %c0_26 = arith.constant 0 : index
    %c0_27 = arith.constant 0 : index
    %41 = vector.load %arg2[%40, %c0_26, %c0_27] : memref<4x8x16xf32, #tpu.memory_space<vmem>>, vector<1x8x16xf32>
    %42 = vector.shape_cast %41 : vector<1x8x16xf32> to vector<8x16xf32>
    %c0_28 = arith.constant 0 : index
    %c0_29 = arith.constant 0 : index
    %43 = vector.load %arg3[%c0_28, %c0_29] : memref<16x128xf32, #tpu.memory_space<vmem>>, vector<16x128xf32>
    %cst_30 = arith.constant dense<0.000000e+00> : vector<8x128xf32>
    %44 = tpu.matmul %42, %43, %cst_30 {dimension_numbers = #tpu.dot_dimension_numbers<[1], [0], [0], [1], [0, 0, 1, 1], [], []>} : vector<8x16xf32>, vector<16x128xf32>, vector<8x128xf32> -> vector<8x128xf32>
    %c0_31 = arith.constant 0 : index
    %c0_32 = arith.constant 0 : index
    %45 = vector.load %arg4[%c0_31, %c0_32] : memref<128x128xf32, #tpu.memory_space<vmem>>, vector<128x128xf32>
    %cst_33 = arith.constant dense<0.000000e+00> : vector<8x128xf32>
    %46 = tpu.matmul %35, %45, %cst_33 {dimension_numbers = #tpu.dot_dimension_numbers<[1], [0], [0], [1], [0, 0, 1, 1], [], []>} : vector<8x128xf32>, vector<128x128xf32>, vector<8x128xf32> -> vector<8x128xf32>
    %cst_34 = arith.constant 5.000000e-01 : f32
    %47 = vector.broadcast %cst_34 : f32 to vector<8x128xf32>
    %48 = arith.mulf %47, %35 : vector<8x128xf32>
    %49 = arith.addf %44, %46 : vector<8x128xf32>
    %50 = math.tanh %49 : vector<8x128xf32>
    %cst_35 = arith.constant 5.000000e-01 : f32
    %51 = vector.broadcast %cst_35 : f32 to vector<8x128xf32>
    %52 = arith.mulf %51, %50 : vector<8x128xf32>
    %53 = arith.addf %48, %52 : vector<8x128xf32>
    %54 = arith.index_cast %c2_i32 : i32 to index
    %c0_36 = arith.constant 0 : index
    %c0_37 = arith.constant 0 : index
    %55 = vector.load %arg5[%54, %c0_36, %c0_37] : memref<4x8x128xf32, #tpu.memory_space<vmem>>, vector<1x8x128xf32>
    %56 = vector.shape_cast %55 : vector<1x8x128xf32> to vector<8x128xf32>
    %57 = vector.shape_cast %53 : vector<8x128xf32> to vector<1x8x128xf32>
    tpu.vector_store %arg5[%54, %c0_36, %c0_37], %57 {strides = array<i32>} : memref<4x8x128xf32, #tpu.memory_space<vmem>>, vector<1x8x128xf32>,
    %c3_i32 = arith.constant 3 : i32
    %58 = arith.index_cast %c3_i32 : i32 to index
    %c0_38 = arith.constant 0 : index
    %c0_39 = arith.constant 0 : index
    %59 = vector.load %arg2[%58, %c0_38, %c0_39] : memref<4x8x16xf32, #tpu.memory_space<vmem>>, vector<1x8x16xf32>
    %60 = vector.shape_cast %59 : vector<1x8x16xf32> to vector<8x16xf32>
    %c0_40 = arith.constant 0 : index
    %c0_41 = arith.constant 0 : index
    %61 = vector.load %arg3[%c0_40, %c0_41] : memref<16x128xf32, #tpu.memory_space<vmem>>, vector<16x128xf32>
    %cst_42 = arith.constant dense<0.000000e+00> : vector<8x128xf32>
    %62 = tpu.matmul %60, %61, %cst_42 {dimension_numbers = #tpu.dot_dimension_numbers<[1], [0], [0], [1], [0, 0, 1, 1], [], []>} : vector<8x16xf32>, vector<16x128xf32>, vector<8x128xf32> -> vector<8x128xf32>
    %c0_43 = arith.constant 0 : index
    %c0_44 = arith.constant 0 : index
    %63 = vector.load %arg4[%c0_43, %c0_44] : memref<128x128xf32, #tpu.memory_space<vmem>>, vector<128x128xf32>
    %cst_45 = arith.constant dense<0.000000e+00> : vector<8x128xf32>
    %64 = tpu.matmul %53, %63, %cst_45 {dimension_numbers = #tpu.dot_dimension_numbers<[1], [0], [0], [1], [0, 0, 1, 1], [], []>} : vector<8x128xf32>, vector<128x128xf32>, vector<8x128xf32> -> vector<8x128xf32>
    %cst_46 = arith.constant 5.000000e-01 : f32
    %65 = vector.broadcast %cst_46 : f32 to vector<8x128xf32>
    %66 = arith.mulf %65, %53 : vector<8x128xf32>
    %67 = arith.addf %62, %64 : vector<8x128xf32>
    %68 = math.tanh %67 : vector<8x128xf32>
    %cst_47 = arith.constant 5.000000e-01 : f32
    %69 = vector.broadcast %cst_47 : f32 to vector<8x128xf32>
    %70 = arith.mulf %69, %68 : vector<8x128xf32>
    %71 = arith.addf %66, %70 : vector<8x128xf32>
    %72 = arith.index_cast %c3_i32 : i32 to index
    %c0_48 = arith.constant 0 : index
    %c0_49 = arith.constant 0 : index
    %73 = vector.load %arg5[%72, %c0_48, %c0_49] : memref<4x8x128xf32, #tpu.memory_space<vmem>>, vector<1x8x128xf32>
    %74 = vector.shape_cast %73 : vector<1x8x128xf32> to vector<8x128xf32>
    %75 = vector.shape_cast %71 : vector<8x128xf32> to vector<1x8x128xf32>
    tpu.vector_store %arg5[%72, %c0_48, %c0_49], %75 {strides = array<i32>} : memref<4x8x128xf32, #tpu.memory_space<vmem>>, vector<1x8x128xf32>,
    %c4_i32 = arith.constant 4 : i32
    %c0_50 = arith.constant 0 : index
    %c0_51 = arith.constant 0 : index
    %76 = vector.load %arg6[%c0_50, %c0_51] : memref<8x128xf32, #tpu.memory_space<vmem>>, vector<8x128xf32>
    tpu.vector_store %arg6[%c0_50, %c0_51], %71 {strides = array<i32>} : memref<8x128xf32, #tpu.memory_space<vmem>>, vector<8x128xf32>,
    return
  }
  func.func @transform_0(%arg0: i32, %arg1: i32) -> (i32, i32, i32) {
    %c0_i32 = arith.constant 0 : i32
    %c0_i32_0 = arith.constant 0 : i32
    return %arg1, %arg0, %c0_i32 : i32, i32, i32
  }
  func.func @transform_1(%arg0: i32, %arg1: i32) -> (i32, i32) {
    %c0_i32 = arith.constant 0 : i32
    %c0_i32_0 = arith.constant 0 : i32
    %c0_i32_1 = arith.constant 0 : i32
    return %c0_i32, %c0_i32_0 : i32, i32
  }
  func.func @transform_2(%arg0: i32, %arg1: i32) -> (i32, i32) {
    %c0_i32 = arith.constant 0 : i32
    %c0_i32_0 = arith.constant 0 : i32
    %c0_i32_1 = arith.constant 0 : i32
    return %c0_i32, %c0_i32_0 : i32, i32
  }
  func.func @transform_3(%arg0: i32, %arg1: i32) -> (i32, i32, i32) {
    %c0_i32 = arith.constant 0 : i32
    %c0_i32_0 = arith.constant 0 : i32
    return %arg1, %arg0, %c0_i32 : i32, i32, i32
  }
}

</mosaic_0001>

<bundles_post_ra>
// kernel: tpu_custom_call.1
= control target key start
LH: loop header
LB: loop body
LE: loop exit
PB: predicated region body
PF: predicated region fallthrough
CT: control target
= control target key end

     0   :  { %8 = vsyncpa [#allocation4], 0  ;;  %s1164_s0 = inlined_call_operand.hbm [shape: f32[8,8,16], index: 0, kind: input, shape index: {}]   ;;  %s1165_s1 = inlined_call_operand.hbm [shape: f32[16,128], index: 1, kind: input, shape index: {}]   ;;  %s1166_s2 = inlined_call_operand.hbm [shape: f32[128,128], index: 2, kind: input, shape index: {}]   ;;  %s1167_s3 = inlined_call_operand.hbm [shape: f32[8,8,128], index: 3, kind: output, shape index: {}]  }
   0x1   :  { %10 = vsyncpa [#allocation4 + $0x1], 0 }
   0x2   :  { %11 = vsyncpa [#allocation7], 0 }
   0x3   :  { %12 = vsyncpa [#allocation5], 0 }
   0x4   :  { %14 = vsyncpa [#allocation5 + $0x1], 0  ;;  %s979_s12 = smov 0   ;;  %s981_s13 = smov 0  }
   0x5   :  { %s983_s14 = smov 0   ;;  %s985_s15 = smov 0  }
   0x6   :  { %s987_s16 = smov 0   ;;  %s989_s17 = smov 0  }
   0x7 LB: > { %s646_s18 = sadd.s32 4294967295, %s950_s17   ;;  %s647_s19 = sadd.s32 4294967294, %s950_s17   ;;  %s950_s17 = sphi %s989_s17, %s20_s17   ;;  %s946_s16 = sphi %s987_s16, %s1177_s16   ;;  %s942_s15 = sphi %s985_s15, %s1176_s15   ;;  %s938_s14 = sphi %s983_s14, %s1175_s14   ;;  %s934_s13 = sphi %s981_s13, %s1174_s13   ;;  %s930_s12 = sphi %s979_s12, %s1173_s12  }
   0x8   : > { %p54_p0 = scmp.ne.s32.totalorder %s934_s13, %s930_s12  ;;  %p1015_p1 = scmp.eq.s32.totalorder %s646_s18, 0 }
   0x9   : > { %p128_p2 = scmp.eq.s32.totalorder %s647_s19, 1  ;;  %p648_p4 = scmp.ge.s32.totalorder %s950_s17, 1 }
   0xa   : > { %p1021_p3 = por %p1015_p1, %p54_p0  ;;  %p135_p6 = scmp.lt.s32.totalorder %s950_s17, 3 }
   0xb   : > { %p1026_p5 = por %p128_p2, %p54_p0  ;;  %s146_s25 = sshll.u32 %s1165_s1, 4  ;;  %s147_s25 = int_to_ptr.hbm [resolvable:$true] %s146_s25 }
   0xc   : > { %p1034_p7 = pnand %p648_p4, %p135_p6  ;;  %s952_s27 = smov [#allocation6]  }
   0xd   : > { %s148_s28 = sshll.u32 %s952_s27, 4  ;;  %p651_p10 = scmp.ge.s32.totalorder %s950_s17, 2  ;;  %s149_s28 = int_to_ptr.vmem [resolvable:$true] %s148_s28 }
   0xe   : > { %p690_p8 = pneg %p1034_p7  ;;  %s160_s4 = sshll.u32 %s1166_s2, 4  ;;  %s161_s4 = int_to_ptr.hbm [resolvable:$true] %s160_s4 }
   0xf   : > { %s953_s5 = smov 128   ;;  %s954_s6 = smov 8  }
  0x10   : > { %p691_p9 = pnand %p690_p8, %p1015_p1  ;;  %s955_s7 = smov [#allocation8]  }
  0x11   : > { %s162_s8 = sshll.u32 %s955_s7, 4  ;;  %p122_p11 = scmp.eq.s32.totalorder %s646_s18, 1  ;;  %s163_s8 = int_to_ptr.vmem [resolvable:$true] %s162_s8 }
  0x12   : > { %693 = dma.hbm_to_vmem [thread:$0]  (!%p691_p9), %s147_s25, 256, %s149_s28, [#allocation7], %s953_s5, %s953_s5, %s954_s6  }
  0x13   : > { %696 = dma.hbm_to_vmem [thread:$0]  (!%p691_p9), %s161_s4, 2048, %s163_s8, [#allocation7], %s953_s5, %s953_s5, %s954_s6  }
  0x14   : > { %s29_s9 = sadd.s32 1, %s946_s16  ;;  %s41_s10 = sadd.s32 1, %s938_s14 }
  0x15   : > { %p30_p12 = scmp.ge.s32.totalorder %s29_s9, 2  ;;  %p48_p13 = scmp.ne.s32.totalorder %s938_s14, %s934_s13 }
  0x16   : > { %p49_p0 = scmp.eq.s32.totalorder %s950_s17, 0  ;;  %p707_p4 = scmp.lt.s32.totalorder %s950_s17, 2 }
  0x17   : > { %s1179_s9 = smov (%p30_p12, %s29_s9), 0  ;;  %p1061_p2 = por %p122_p11, %p48_p13 }
  0x18   : > { %s36_s19 = ssub.s32 %s946_s16, %s1179_s9  ;;  %s176_s23 = sand.u32 1, %s938_s14  }
  0x19   : > { %p39_p6 = scmp.eq.s32.totalorder %s36_s19, 0  ;;  %p50_p8 = por %p49_p0, %p48_p13 }
  0x1a   : > { %s652_s24 = sshll.u32 %s176_s23, 5  ;;  %s676_s18 = sshll.u32 %s946_s16, 5 }
  0x1b   : > { %s1071_s25 = scalar_select %p39_p6, %s938_s14, %s41_s10  }
  0x1c   : > { %s186_s29 = scalar_lea.hbm %s1164_s0, %s676_s18  ;;  %s180_s4 = scalar_lea.vmem [#allocation3], %s652_s24 }
  0x1d   : > { %s187_s30 = sshll.u32 %s186_s29, 4  ;;  %s189_s7 = sshll.u32 %s180_s4, 4  ;;  %s188_s30 = int_to_ptr.hbm [resolvable:$true] %s187_s30  ;;  %s190_s7 = int_to_ptr.vmem [resolvable:$true] %s189_s7 }
  0x1e   : > { %p698_p9 = pnand %p707_p4, %p50_p8  ;;  %s177_s8 = scalar_lea.sflag [#allocation4], %s176_s23 }
  0x1f   : > { %201 = sbr.rel (%p1034_p7) target bundleno = 661 (0x295), region = 32  ;;  %s1084_s10 = sand.u32 (!%p1034_p7), 1, %s934_s13  }
  0x20   : > { %700 = dma.hbm_to_vmem [thread:$0]  (!%p698_p9), %s188_s30, 512, %s190_s7, %s177_s8, %s953_s5, %s953_s5, %s954_s6  }
  0x21   : > { %s656_s19 = sshll.u32 (!%p1034_p7), %s1084_s10, 5  ;;  %s204_s24 = scalar_lea.sflag (!%p1034_p7), [#allocation4], %s1084_s10 }
  0x22   : > { %s1088_s18 = scalar_lea.vmem (!%p1034_p7), [#allocation3], %s656_s19 }
  0x24   : > { %917 = dma.done.wait (%p1021_p3), %s204_s24, 512  }
  0x25   : > { %919 = vsyncadd (%p1021_p3), %s204_s24, 4294966784 }
  0x26   : > { %921 = dma.done.wait (%p1015_p1), [#allocation7], 2304  }
  0x27   : > { %923 = vsyncadd (%p1015_p1), [#allocation7], 4294964992  ;;  %s1098_s26 = scalar_lea.vmem [#allocation9], %s656_s19  ;;  %p660_p7 = scmp.ne.s32.totalorder %s942_s15, 0 }
  0x29   : > { %246 = sbr.rel (%p660_p7) target bundleno = 48 (0x30), region = 48 }
  0x2e   : > { %v956_v0 = vmov 0.0  }
  0x2f   : > { %247 = vst [vmem:[#allocation2] sm:$0xff] %v956_v0 }
  0x30 PF: > { %v267_v1 = vld [vmem:[#allocation8 + $0x78] sm:$0xff]  ;;  %v266_v2 = vld [vmem:[#allocation8 + $0x70] sm:$0xff]  ;;  %v265_v3 = vld [vmem:[#allocation8 + $0x68] sm:$0xff]  ;;  %vm289_vm0 = vcmask 130048   ;;  %s677_s20 = sshll.u32 %s942_s15, 5  ;;  %s539_s23 = sshll.u32 %s1098_s26, 4  ;;  %s540_s23 = int_to_ptr.vmem [resolvable:$true] %s539_s23 }
  0x31   : > { %268 = vmatpush.msra.mxu0 %v267_v1  ;;  %337 = vmatpush.msra.mxu2 %v267_v1  ;;  %v264_v4 = vld [vmem:[#allocation8 + $0x60] sm:$0xff]  ;;  %v1101_v5 = vld [vmem:[#allocation6 + $0x8] sm:$0xff]  ;;  %v1103_v6 = vld [vmem:[#allocation6] sm:$0xff]  ;;  %s538_s6 = scalar_lea.hbm %s1167_s3, %s677_s20  ;;  %s526_s28 = scalar_lea.sflag [#allocation5], %s1084_s10 }
  0x32   : > { %v263_v7 = vld [vmem:[#allocation8 + $0x58] sm:$0xff]  ;;  %307 = vmatpush.msra.mxu1 %v1101_v5  ;;  %v249_v8 = vld [vmem:[%s1088_s18] sm:$0xff]  ;;  %444 = vmatpush.msra.mxu3 %v1101_v5  ;;  %v261_v10 = vld [vmem:[#allocation8 + $0x48] sm:$0xff]  ;;  %s541_s27 = sshll.u32 %s538_s6, 4  ;;  %s884_s7 = scalar_lea.hbm %s1167_s3, 64  ;;  %s542_s27 = int_to_ptr.hbm [resolvable:$true] %s541_s27 }
  0x33   : > { %269 = vmatpush.msra.mxu0 %v266_v2  ;;  %338 = vmatpush.msra.mxu2 %v266_v2  ;;  %v262_v9 = vld [vmem:[#allocation8 + $0x50] sm:$0xff]  ;;  %v260_v11 = vld [vmem:[#allocation8 + $0x40] sm:$0xff]  ;;  %v259_v12 = vld [vmem:[#allocation8 + $0x38] sm:$0xff]  ;;  %s878_s29 = sshra.s32 %s542_s27, 4  ;;  %s879_s29 = int_to_ptr.hbm [resolvable:$true] %s878_s29 }
  0x34   : > { %308 = vmatpush.msra.mxu1 %v1103_v6  ;;  %445 = vmatpush.msra.mxu3 %v1103_v6  ;;  %v258_v13 = vld [vmem:[#allocation8 + $0x30] sm:$0xff]  ;;  %v257_v14 = vld [vmem:[#allocation8 + $0x28] sm:$0xff]  ;;  %v256_v15 = vld [vmem:[#allocation8 + $0x20] sm:$0xff]  ;;  %s880_s15 = scalar_lea.hbm %s879_s29, 32  ;;  %p885_p12 = scmp.lt.s32.totalorder %s879_s29, %s1167_s3 }
  0x35   : > { %270 = vmatpush.msra.mxu0 %v265_v3  ;;  %339 = vmatpush.msra.mxu2 %v265_v3  ;;  %v255_v16 = vld [vmem:[#allocation8 + $0x18] sm:$0xff]  ;;  %v254_v17 = vld [vmem:[#allocation8 + $0x10] sm:$0xff]  ;;  %v253_v18 = vld [vmem:[#allocation8 + $0x8] sm:$0xff]  ;;  %p881_p1 = scmp.ne.s32.totalorder %s879_s29, %s880_s15  ;;  %p886_p13 = scmp.lt.s32.totalorder %s884_s7, %s880_s15 }
  0x36   : > { %661 = vmatmul.msk.f32.vlgmr.msra.gmra.mxu1 %vm289_vm0, %v249_v8  ;;  %475 = vmatpush.msrb.mxu3 %v267_v1  ;;  %v252_v19 = vld [vmem:[#allocation8] sm:$0xff]  ;;  %v248_v20 = vld [vmem:[#allocation2] sm:$0xff]  ;;  %v662_v28 = vld [vmem:[%s1088_s18 + $0x8] sm:$0xff] }
  0x37   : > { %271 = vmatpush.msra.mxu0 %v264_v4  ;;  %340 = vmatpush.msra.mxu2 %v264_v4  ;;  %v288_v24 = vmul.f32 0.5, %v248_v20  ;;  %v665_v29 = vld [vmem:[%s1088_s18 + $0x10] sm:$0xff]  ;;  %v668_v37 = vld [vmem:[%s1088_s18 + $0x18] sm:$0xff]  ;;  %p882_p3 = pnand %p881_p1, %p1061_p2  ;;  %p887_p0 = por %p886_p13, %p885_p12 }
  0x38   : > { %406 = vmatpush.msrb.mxu1 %v267_v1  ;;  %476 = vmatpush.msrb.mxu3 %v266_v2 }
  0x39   : > { %272 = vmatpush.msra.mxu0 %v263_v7  ;;  %341 = vmatpush.msra.mxu2 %v263_v7  ;;  %p883_p11 = pneg %p882_p3 }
  0x3a   : > { %407 = vmatpush.msrb.mxu1 %v266_v2  ;;  %477 = vmatpush.msrb.mxu3 %v265_v3 }
  0x3b   : > { %273 = vmatpush.msra.mxu0 %v262_v9  ;;  %342 = vmatpush.msra.mxu2 %v262_v9  ;;  %p888_p4 = pnand %p887_p0, %p883_p11 }
  0x3c   : > { %408 = vmatpush.msrb.mxu1 %v265_v3  ;;  %478 = vmatpush.msrb.mxu3 %v264_v4 }
  0x3d   : > { %274 = vmatpush.msra.mxu0 %v261_v10  ;;  %343 = vmatpush.msra.mxu2 %v261_v10 }
  0x3e   : > { %409 = vmatpush.msrb.mxu1 %v264_v4  ;;  %479 = vmatpush.msrb.mxu3 %v263_v7 }
  0x3f   : > { %275 = vmatpush.msra.mxu0 %v260_v11  ;;  %344 = vmatpush.msra.mxu2 %v260_v11 }
  0x40   : > { %410 = vmatpush.msrb.mxu1 %v263_v7  ;;  %480 = vmatpush.msrb.mxu3 %v262_v9 }
  0x41   : > { %276 = vmatpush.msra.mxu0 %v259_v12  ;;  %345 = vmatpush.msra.mxu2 %v259_v12 }
  0x42   : > { %411 = vmatpush.msrb.mxu1 %v262_v9  ;;  %481 = vmatpush.msrb.mxu3 %v261_v10 }
  0x43   : > { %277 = vmatpush.msra.mxu0 %v258_v13  ;;  %346 = vmatpush.msra.mxu2 %v258_v13 }
  0x44   : > { %412 = vmatpush.msrb.mxu1 %v261_v10  ;;  %482 = vmatpush.msrb.mxu3 %v260_v11 }
  0x45   : > { %278 = vmatpush.msra.mxu0 %v257_v14  ;;  %347 = vmatpush.msra.mxu2 %v257_v14 }
  0x46   : > { %413 = vmatpush.msrb.mxu1 %v260_v11  ;;  %483 = vmatpush.msrb.mxu3 %v259_v12 }
  0x47   : > { %279 = vmatpush.msra.mxu0 %v256_v15  ;;  %348 = vmatpush.msra.mxu2 %v256_v15 }
  0x48   : > { %414 = vmatpush.msrb.mxu1 %v259_v12  ;;  %484 = vmatpush.msrb.mxu3 %v258_v13 }
  0x49   : > { %280 = vmatpush.msra.mxu0 %v255_v16  ;;  %349 = vmatpush.msra.mxu2 %v255_v16 }
  0x4a   : > { %415 = vmatpush.msrb.mxu1 %v258_v13  ;;  %485 = vmatpush.msrb.mxu3 %v257_v14 }
  0x4b   : > { %281 = vmatpush.msra.mxu0 %v254_v17  ;;  %350 = vmatpush.msra.mxu2 %v254_v17 }
  0x4c   : > { %416 = vmatpush.msrb.mxu1 %v257_v14  ;;  %486 = vmatpush.msrb.mxu3 %v256_v15 }
  0x4d   : > { %282 = vmatpush.msra.mxu0 %v253_v18  ;;  %351 = vmatpush.msra.mxu2 %v253_v18 }
  0x4e   : > { %417 = vmatpush.msrb.mxu1 %v256_v15  ;;  %487 = vmatpush.msrb.mxu3 %v255_v16 }
  0x4f   : > { %283 = vmatpush.msra.mxu0 %v252_v19  ;;  %352 = vmatpush.msra.mxu2 %v252_v19 }
  0x50   : > { %284 = vmatmul.f32.vlgmr.msra.gmra.mxu0 %v248_v20  ;;  %418 = vmatpush.msrb.mxu1 %v255_v16 }
  0x51   : > { %375 = vmatpush.msrb.mxu2 %v1101_v5  ;;  %513 = vmatpush.msrb.mxu0 %v1101_v5 }
  0x52   : > { %419 = vmatpush.msrb.mxu1 %v254_v17  ;;  %488 = vmatpush.msrb.mxu3 %v254_v17 }
  0x53   : > { %376 = vmatpush.msrb.mxu2 %v1103_v6  ;;  %514 = vmatpush.msrb.mxu0 %v1103_v6 }
  0x54   : > { %420 = vmatpush.msrb.mxu1 %v253_v18  ;;  %489 = vmatpush.msrb.mxu3 %v253_v18 }
  0x55   : > { %666 = vmatmul.msk.f32.vlgmr.msra.gmra.mxu3 %vm289_vm0, %v665_v29 }
  0x56   : > { %421 = vmatpush.msrb.mxu1 %v252_v19  ;;  %490 = vmatpush.msrb.mxu3 %v252_v19 }
  0x58   : > { %669 = vmatmul.msk.f32.vlgmr.msrb.gmra.mxu0 %vm289_vm0, %v668_v37 }
  0xb3   : > { %v310_v21 = vpop.f32.mrf.mxu1 }
  0xcd   : > { %v285_v22 = vpop.f32.mrf.mxu0 }
  0xce   : > { %v311_v23 = vadd.f32 %v310_v21, %v285_v22 }
  0xd0   : > { %766 = vtanh.f32 %v311_v23 }
  0xd5   : > { %v516_v45 = vpop.f32.mrf.mxu0 }
  0xd6   : > { %v767_v25 = vpop.eup %766 }
  0xd7   : > { %v314_v26 = vmul.f32 0.5, %v767_v25 }
  0xd8   : > { %v447_v38 = vpop.f32.mrf.mxu3 }
  0xd9   : > { %v315_v27 = vadd.f32 %v314_v26, %v288_v24 }
  0xdb   : > { %316 = vst [vmem:[%s1098_s26] sm:$0xff] %v315_v27  ;;  %353 = vmatmul.f32.vlgmr.msra.gmra.mxu2 %v315_v27  ;;  %v357_v35 = vmul.f32 0.5, %v315_v27 }
  0xe3   : > { %663 = vmatmul.msk.f32.vlgmr.msrb.gmra.mxu2 %vm289_vm0, %v662_v28 }
 0x15e   : > { %v354_v30 = vpop.f32.mrf.mxu2 }
 0x166   : > { %v378_v31 = vpop.f32.mrf.mxu2 }
 0x167   : > { %v379_v32 = vadd.f32 %v378_v31, %v354_v30 }
 0x169   : > { %768 = vtanh.f32 %v379_v32 }
 0x16f   : > { %v769_v33 = vpop.eup %768 }
 0x170   : > { %v382_v34 = vmul.f32 0.5, %v769_v33 }
 0x172   : > { %v383_v36 = vadd.f32 %v382_v34, %v357_v35 }
 0x174   : > { %664 = vst [vmem:[%s1098_s26 + $0x8] sm:$0xff] %v383_v36  ;;  %422 = vmatmul.f32.vlgmr.msrb.gmra.mxu1 %v383_v36  ;;  %v426_v43 = vmul.f32 0.5, %v383_v36 }
 0x1f1   : > { %v423_v39 = vpop.f32.mrf.mxu1 }
 0x1f2   : > { %v448_v40 = vadd.f32 %v447_v38, %v423_v39 }
 0x1f4   : > { %770 = vtanh.f32 %v448_v40 }
 0x1fa   : > { %v771_v41 = vpop.eup %770 }
 0x1fb   : > { %v451_v42 = vmul.f32 0.5, %v771_v41 }
 0x1fd   : > { %v452_v44 = vadd.f32 %v451_v42, %v426_v43 }
 0x1ff   : > { %667 = vst [vmem:[%s1098_s26 + $0x10] sm:$0xff] %v452_v44  ;;  %491 = vmatmul.f32.vlgmr.msrb.gmra.mxu3 %v452_v44  ;;  %v495_v49 = vmul.f32 0.5, %v452_v44 }
 0x282   : > { %v492_v46 = vpop.f32.mrf.mxu3 }
 0x283   : > { %v517_v47 = vadd.f32 %v516_v45, %v492_v46 }
 0x285   : > { %772 = vtanh.f32 %v517_v47 }
 0x28b   : > { %v773_v48 = vpop.eup %772 }
 0x28c   : > { %v520_v50 = vmul.f32 0.5, %v773_v48 }
 0x28e   : > { %v521_v51 = vadd.f32 %v520_v50, %v495_v49 }
 0x290   : > { %670 = vst [vmem:[%s1098_s26 + $0x18] sm:$0xff] %v521_v51 }
 0x291   : > { %524 = vst [vmem:[#allocation2] sm:$0xff] %v521_v51 }
 0x292   : > { %891 = shalt.err (!%p888_p4)
}
 0x293   : > { %s957_s10 = smov 128   ;;  %s958_s24 = smov 8  }
 0x294   : > { %688 = dma.vmem_to_hbm [thread:$0]  (%p1061_p2), %s540_s23, 512, %s542_s27, %s526_s28, %s957_s10, %s957_s10, %s958_s24  }
 0x295 PF: > { %s556_s18 = sand.u32 1, %s930_s12   ;;  %p702_p6 = pnand %p651_p10, %p1026_p5 }
 0x296   : > { %s557_s26 = scalar_lea.sflag [#allocation5], %s556_s18 }
 0x297   : > { %p703_p8 = pneg %p702_p6 }
 0x299   : > { %925 = dma.done.wait (%p703_p8), %s557_s26, 512  }
 0x29a   : > { %927 = vsyncadd (%p703_p8), %s557_s26, 4294966784  ;;  %s20_s17 = sadd.s32 1, %s950_s17   ;;  %s1173_s12 = smov %s934_s13 }
 0x29b   : > { %p17_p9 = scmp.ge.s32.totalorder %s20_s17, 4   ;;  %s1174_s13 = smov %s938_s14 }
 0x29c   : > { %s1175_s14 = smov %s1071_s25  ;;  %s1176_s15 = smov %s946_s16 }
 0x29d   : > { %s1177_s16 = smov %s1179_s9  ;;  %19 = sbr.rel (!%p17_p9) target bundleno = 7 (0x7), region = 95 }
 0x2a2   :  { %563 = vsyncpa [#allocation4], 1 }
 0x2a3   :  { %565 = vsyncpa [#allocation4 + $0x1], 1 }
 0x2a4   :  { %566 = vsyncpa [#allocation7], 1 }
 0x2a5   :  { %567 = vsyncpa [#allocation5], 1 }
 0x2a6   :  { %569 = vsyncpa [#allocation5 + $0x1], 1 }

</bundles_post_ra>
